<compile_context>
chip_gen: v7x
topology: tpu7x:2x2x1
jax: 0.10.0
libtpu: 0.0.40
codegen_flags: <defaults>
</compile_context>

<pallas_src>
import functools

import jax
import jax.numpy as jnp
from jax.experimental import pallas as pl
from jax.experimental.pallas import tpu as pltpu


def ca_kernel(x_ref, w1_ref, b1_ref, w2_ref, b2_ref, o_ref, *, inv_hw, bt):
    # x_ref / o_ref : (Bt, C, HWp) block (Bt batch elements per grid step)
    # w1_ref: (Cr, C)  b1_ref: (Cr, 1)  w2_ref: (C, Cr)  b2_ref: (C, 1)  -- resident
    w1 = w1_ref[...]
    b1 = b1_ref[...]
    w2 = w2_ref[...]
    b2 = b2_ref[...]

    for b in range(bt):  # static unroll over the small batch tile
        xb = x_ref[b].astype(jnp.float32)                          # (C, HWp)

        # Global average pool: padded lanes are zero, so the sum is exact;
        # divide by the true H*W.
        pooled = jnp.sum(xb, axis=-1, keepdims=True) * inv_hw      # (C, 1)

        # 1x1-conv MLP on the pooled channel vector (f32 accumulation).
        hidden = jax.lax.dot_general(
            w1, pooled, (((1,), (0,)), ((), ())),
            preferred_element_type=jnp.float32) + b1               # (Cr, 1)
        hidden = jnp.maximum(hidden, 0.0)                          # ReLU
        logits = jax.lax.dot_general(
            w2, hidden, (((1,), (0,)), ((), ())),
            preferred_element_type=jnp.float32) + b2               # (C, 1)
        scale = 1.0 / (1.0 + jnp.exp(-logits))                     # Sigmoid (EUP)

        # Per-channel rescale, broadcast across the spatial (lane) axis.
        o_ref[b] = (xb * scale).astype(o_ref.dtype)


def ca_forward(x, w1, b1, w2, b2):
    """CALayer forward.

    x : (B, C, H, W)
    w1: (Cr, C)   -- Conv2d(C, C//r, 1) weight, squeezed
    b1: (Cr,)
    w2: (C, Cr)   -- Conv2d(C//r, C, 1) weight, squeezed
    b2: (C,)
    returns (B, C, H, W)
    """
    B, C, H, W = x.shape
    Cr = w1.shape[0]
    HW = H * W
    HWp = ((HW + 127) // 128) * 128                    # lane-dense last dim

    xf = x.reshape(B, C, HW)
    if HWp != HW:
        xf = jnp.pad(xf, ((0, 0), (0, 0), (0, HWp - HW)))   # zeros: inert for the mean

    # Pack several batch elements per grid step so each DMA block is ~1-2 MiB
    # (tiny blocks leave the kernel far below the HBM roofline); cap the static
    # unroll at 16.
    per_b_bytes = C * HWp * x.dtype.itemsize
    target_bytes = 2 * 1024 * 1024
    Bt = int(max(1, min(B, target_bytes // max(per_b_bytes, 1), 16)))
    nb = pl.cdiv(B, Bt)
    Bp = nb * Bt
    if Bp != B:
        xf = jnp.pad(xf, ((0, Bp - B), (0, 0), (0, 0)))

    # Weights/biases in f32, shaped for the column-vector MLP inside the kernel.
    w1k = jnp.asarray(w1, jnp.float32)                 # (Cr, C)
    w2k = jnp.asarray(w2, jnp.float32)                 # (C, Cr)
    b1k = jnp.asarray(b1, jnp.float32).reshape(Cr, 1)  # (Cr, 1)
    b2k = jnp.asarray(b2, jnp.float32).reshape(C, 1)   # (C, 1)

    block_bytes = Bt * per_b_bytes
    weight_bytes = 4 * (Cr * C * 2 + Cr + C)
    # in + out blocks are double-buffered -> ~4x block bytes live, plus headroom.
    needed = 4 * block_bytes + 4 * weight_bytes + (4 << 20)
    vmem_limit = int(min(max(needed, 16 << 20), 48 << 20))
    # TODO(synk): for very large C*H*W per batch (block >> 10 MiB on v7x) switch to a
    # two-pass spatially tiled variant (pool+MLP kernel, then a scale kernel).

    kernel = functools.partial(ca_kernel, inv_hw=1.0 / float(HW), bt=Bt)
    out = pl.pallas_call(
        kernel,
        out_shape=jax.ShapeDtypeStruct((Bp, C, HWp), x.dtype),
        grid=(nb,),
        in_specs=[
            pl.BlockSpec((Bt, C, HWp), lambda i: (i, 0, 0)),   # x, Bt batches per step
            pl.BlockSpec((Cr, C), lambda i: (0, 0)),           # W1 (resident)
            pl.BlockSpec((Cr, 1), lambda i: (0, 0)),           # b1
            pl.BlockSpec((C, Cr), lambda i: (0, 0)),           # W2
            pl.BlockSpec((C, 1), lambda i: (0, 0)),            # b2
        ],
        out_specs=pl.BlockSpec((Bt, C, HWp), lambda i: (i, 0, 0)),
        compiler_params=pltpu.CompilerParams(
            dimension_semantics=("parallel",),
            vmem_limit_bytes=vmem_limit,
        ),
    )(xf, w1k, b1k, w2k, b2k)

    return out[:B, :, :HW].reshape(B, C, H, W)


def ca_reference(x, w1, b1, w2, b2):
    """Pure-JAX reference matching the PyTorch CALayer exactly."""
    xf = x.astype(jnp.float32)
    y = jnp.mean(xf, axis=(2, 3))                               # (B, C) global avg pool
    h = jnp.maximum(y @ jnp.asarray(w1, jnp.float32).T + b1, 0.0)
    s = jax.nn.sigmoid(h @ jnp.asarray(w2, jnp.float32).T + b2)  # (B, C)
    return (xf * s[:, :, None, None]).astype(x.dtype)


if __name__ == "__main__":
    key = jax.random.PRNGKey(0)
    k1, k2, k3, k4, k5, k6 = jax.random.split(key, 6)

    # Config 1: channel=64, reduction=16 (Conv2d needs channel // reduction >= 1).
    B, C, H, W, r = 2, 64, 16, 16, 16
    Cr = C // r
    x = jax.random.normal(k1, (B, C, H, W), dtype=jnp.float32)
    w1 = jax.random.normal(k2, (Cr, C), dtype=jnp.float32) * 0.1   # Conv2d(C, Cr, 1) weight
    b1 = jax.random.normal(k3, (Cr,), dtype=jnp.float32) * 0.1
    w2 = jax.random.normal(k4, (C, Cr), dtype=jnp.float32) * 0.1   # Conv2d(Cr, C, 1) weight
    b2 = jax.random.normal(k5, (C,), dtype=jnp.float32) * 0.1

    out = jax.block_until_ready(ca_forward(x, w1, b1, w2, b2))
    ref = ca_reference(x, w1, b1, w2, b2)
    assert out.shape == x.shape
    assert jnp.allclose(out, ref, atol=1e-4, rtol=1e-4)

    # Config 2: H=W=7 (H*W not a multiple of 128) exercises the lane-padding path.
    B2, C2, H2, W2, r2 = 3, 32, 7, 7, 16
    Cr2 = C2 // r2
    x2 = jax.random.normal(k6, (B2, C2, H2, W2), dtype=jnp.float32)
    w1b = jax.random.normal(k2, (Cr2, C2), dtype=jnp.float32) * 0.1
    b1b = jax.random.normal(k3, (Cr2,), dtype=jnp.float32) * 0.1
    w2b = jax.random.normal(k4, (C2, Cr2), dtype=jnp.float32) * 0.1
    b2b = jax.random.normal(k5, (C2,), dtype=jnp.float32) * 0.1

    out2 = jax.block_until_ready(ca_forward(x2, w1b, b1b, w2b, b2b))
    ref2 = ca_reference(x2, w1b, b1b, w2b, b2b)
    assert jnp.allclose(out2, ref2, atol=1e-4, rtol=1e-4)

    print("KERNEL_OK")
</pallas_src>

<mosaic_0001>
module attributes {stable_mosaic.version = 11 : i64} {
  func.func @ca_kernel(%arg0: i32, %arg1: memref<2x64x256xf32, #tpu.memory_space<vmem>>, %arg2: memref<4x64xf32, #tpu.memory_space<vmem>>, %arg3: memref<4x1xf32, #tpu.memory_space<vmem>>, %arg4: memref<64x4xf32, #tpu.memory_space<vmem>>, %arg5: memref<64x1xf32, #tpu.memory_space<vmem>>, %arg6: memref<2x64x256xf32, #tpu.memory_space<vmem>>) attributes {dimension_semantics = [#tpu.dimension_semantics<parallel>], iteration_bounds = array<i64: 1>, scalar_prefetch = 0 : i64, scratch_operands = 0 : i64, tpu.core_type = #tpu.core_type<tc>, window_params = [{transform_indices = @transform_0, window_bounds = array<i64: 2, 64, 256>}, {pipeline_mode = #tpu.pipeline_mode<synchronous>, transform_indices = @transform_1, window_bounds = array<i64: 4, 64>}, {pipeline_mode = #tpu.pipeline_mode<synchronous>, transform_indices = @transform_2, window_bounds = array<i64: 4, 1>}, {pipeline_mode = #tpu.pipeline_mode<synchronous>, transform_indices = @transform_3, window_bounds = array<i64: 64, 4>}, {pipeline_mode = #tpu.pipeline_mode<synchronous>, transform_indices = @transform_4, window_bounds = array<i64: 64, 1>}, {transform_indices = @transform_5, window_bounds = array<i64: 2, 64, 256>}]} {
    %c0 = arith.constant 0 : index
    %c0_0 = arith.constant 0 : index
    %0 = vector.load %arg2[%c0, %c0_0] : memref<4x64xf32, #tpu.memory_space<vmem>>, vector<4x64xf32>
    %c0_1 = arith.constant 0 : index
    %c0_2 = arith.constant 0 : index
    %1 = vector.load %arg3[%c0_1, %c0_2] : memref<4x1xf32, #tpu.memory_space<vmem>>, vector<4x1xf32>
    %c0_3 = arith.constant 0 : index
    %c0_4 = arith.constant 0 : index
    %2 = vector.load %arg4[%c0_3, %c0_4] : memref<64x4xf32, #tpu.memory_space<vmem>>, vector<64x4xf32>
    %c0_5 = arith.constant 0 : index
    %c0_6 = arith.constant 0 : index
    %3 = vector.load %arg5[%c0_5, %c0_6] : memref<64x1xf32, #tpu.memory_space<vmem>>, vector<64x1xf32>
    %c0_7 = arith.constant 0 : index
    %c0_8 = arith.constant 0 : index
    %c0_9 = arith.constant 0 : index
    %4 = vector.load %arg1[%c0_7, %c0_8, %c0_9] : memref<2x64x256xf32, #tpu.memory_space<vmem>>, vector<1x64x256xf32>
    %5 = vector.shape_cast %4 : vector<1x64x256xf32> to vector<64x256xf32>
    %cst = arith.constant dense<0.000000e+00> : vector<64xf32>
    %6 = vector.multi_reduction <add>, %5, %cst [1] : vector<64x256xf32> to vector<64xf32>
    %7 = vector.shape_cast %6 : vector<64xf32> to vector<64x1xf32>
    %cst_10 = arith.constant 3.906250e-03 : f32
    %8 = vector.broadcast %cst_10 : f32 to vector<64x1xf32>
    %9 = arith.mulf %7, %8 : vector<64x1xf32>
    %cst_11 = arith.constant dense<0.000000e+00> : vector<4x1xf32>
    %10 = tpu.matmul %0, %9, %cst_11 {dimension_numbers = #tpu.dot_dimension_numbers<[1], [0], [0], [1], [0, 0, 1, 1], [], []>} : vector<4x64xf32>, vector<64x1xf32>, vector<4x1xf32> -> vector<4x1xf32>
    %11 = arith.addf %10, %1 : vector<4x1xf32>
    %cst_12 = arith.constant 0.000000e+00 : f32
    %12 = vector.broadcast %cst_12 : f32 to vector<4x1xf32>
    %13 = arith.maximumf %11, %12 : vector<4x1xf32>
    %cst_13 = arith.constant dense<0.000000e+00> : vector<64x1xf32>
    %14 = tpu.matmul %2, %13, %cst_13 {dimension_numbers = #tpu.dot_dimension_numbers<[1], [0], [0], [1], [0, 0, 1, 1], [], []>} : vector<64x4xf32>, vector<4x1xf32>, vector<64x1xf32> -> vector<64x1xf32>
    %15 = arith.addf %14, %3 : vector<64x1xf32>
    %cst_14 = arith.constant 0.000000e+00 : f32
    %16 = vector.broadcast %cst_14 : f32 to vector<64x1xf32>
    %17 = arith.subf %16, %15 : vector<64x1xf32>
    %18 = math.exp %17 : vector<64x1xf32>
    %cst_15 = arith.constant 1.000000e+00 : f32
    %19 = vector.broadcast %cst_15 : f32 to vector<64x1xf32>
    %20 = arith.addf %19, %18 : vector<64x1xf32>
    %cst_16 = arith.constant 1.000000e+00 : f32
    %21 = vector.broadcast %cst_16 : f32 to vector<64x1xf32>
    %22 = arith.divf %21, %20 : vector<64x1xf32>
    %23 = vector.broadcast %22 : vector<64x1xf32> to vector<64x256xf32>
    %24 = arith.mulf %5, %23 : vector<64x256xf32>
    %c0_17 = arith.constant 0 : index
    %c0_18 = arith.constant 0 : index
    %c0_19 = arith.constant 0 : index
    %25 = vector.load %arg6[%c0_17, %c0_18, %c0_19] : memref<2x64x256xf32, #tpu.memory_space<vmem>>, vector<1x64x256xf32>
    %26 = vector.shape_cast %25 : vector<1x64x256xf32> to vector<64x256xf32>
    %27 = vector.shape_cast %24 : vector<64x256xf32> to vector<1x64x256xf32>
    tpu.vector_store %arg6[%c0_17, %c0_18, %c0_19], %27 {strides = array<i32>} : memref<2x64x256xf32, #tpu.memory_space<vmem>>, vector<1x64x256xf32>,
    %c1 = arith.constant 1 : index
    %c0_20 = arith.constant 0 : index
    %c0_21 = arith.constant 0 : index
    %28 = vector.load %arg1[%c1, %c0_20, %c0_21] : memref<2x64x256xf32, #tpu.memory_space<vmem>>, vector<1x64x256xf32>
    %29 = vector.shape_cast %28 : vector<1x64x256xf32> to vector<64x256xf32>
    %cst_22 = arith.constant dense<0.000000e+00> : vector<64xf32>
    %30 = vector.multi_reduction <add>, %29, %cst_22 [1] : vector<64x256xf32> to vector<64xf32>
    %31 = vector.shape_cast %30 : vector<64xf32> to vector<64x1xf32>
    %cst_23 = arith.constant 3.906250e-03 : f32
    %32 = vector.broadcast %cst_23 : f32 to vector<64x1xf32>
    %33 = arith.mulf %31, %32 : vector<64x1xf32>
    %cst_24 = arith.constant dense<0.000000e+00> : vector<4x1xf32>
    %34 = tpu.matmul %0, %33, %cst_24 {dimension_numbers = #tpu.dot_dimension_numbers<[1], [0], [0], [1], [0, 0, 1, 1], [], []>} : vector<4x64xf32>, vector<64x1xf32>, vector<4x1xf32> -> vector<4x1xf32>
    %35 = arith.addf %34, %1 : vector<4x1xf32>
    %cst_25 = arith.constant 0.000000e+00 : f32
    %36 = vector.broadcast %cst_25 : f32 to vector<4x1xf32>
    %37 = arith.maximumf %35, %36 : vector<4x1xf32>
    %cst_26 = arith.constant dense<0.000000e+00> : vector<64x1xf32>
    %38 = tpu.matmul %2, %37, %cst_26 {dimension_numbers = #tpu.dot_dimension_numbers<[1], [0], [0], [1], [0, 0, 1, 1], [], []>} : vector<64x4xf32>, vector<4x1xf32>, vector<64x1xf32> -> vector<64x1xf32>
    %39 = arith.addf %38, %3 : vector<64x1xf32>
    %cst_27 = arith.constant 0.000000e+00 : f32
    %40 = vector.broadcast %cst_27 : f32 to vector<64x1xf32>
    %41 = arith.subf %40, %39 : vector<64x1xf32>
    %42 = math.exp %41 : vector<64x1xf32>
    %cst_28 = arith.constant 1.000000e+00 : f32
    %43 = vector.broadcast %cst_28 : f32 to vector<64x1xf32>
    %44 = arith.addf %43, %42 : vector<64x1xf32>
    %cst_29 = arith.constant 1.000000e+00 : f32
    %45 = vector.broadcast %cst_29 : f32 to vector<64x1xf32>
    %46 = arith.divf %45, %44 : vector<64x1xf32>
    %47 = vector.broadcast %46 : vector<64x1xf32> to vector<64x256xf32>
    %48 = arith.mulf %29, %47 : vector<64x256xf32>
    %c1_30 = arith.constant 1 : index
    %c0_31 = arith.constant 0 : index
    %c0_32 = arith.constant 0 : index
    %49 = vector.load %arg6[%c1_30, %c0_31, %c0_32] : memref<2x64x256xf32, #tpu.memory_space<vmem>>, vector<1x64x256xf32>
    %50 = vector.shape_cast %49 : vector<1x64x256xf32> to vector<64x256xf32>
    %51 = vector.shape_cast %48 : vector<64x256xf32> to vector<1x64x256xf32>
    tpu.vector_store %arg6[%c1_30, %c0_31, %c0_32], %51 {strides = array<i32>} : memref<2x64x256xf32, #tpu.memory_space<vmem>>, vector<1x64x256xf32>,
    return
  }
  func.func @transform_0(%arg0: i32) -> (i32, i32, i32) {
    %c0_i32 = arith.constant 0 : i32
    %c0_i32_0 = arith.constant 0 : i32
    %c0_i32_1 = arith.constant 0 : i32
    return %arg0, %c0_i32, %c0_i32_0 : i32, i32, i32
  }
  func.func @transform_1(%arg0: i32) -> (i32, i32) {
    %c0_i32 = arith.constant 0 : i32
    %c0_i32_0 = arith.constant 0 : i32
    %c0_i32_1 = arith.constant 0 : i32
    return %c0_i32, %c0_i32_0 : i32, i32
  }
  func.func @transform_2(%arg0: i32) -> (i32, i32) {
    %c0_i32 = arith.constant 0 : i32
    %c0_i32_0 = arith.constant 0 : i32
    %c0_i32_1 = arith.constant 0 : i32
    return %c0_i32, %c0_i32_0 : i32, i32
  }
  func.func @transform_3(%arg0: i32) -> (i32, i32) {
    %c0_i32 = arith.constant 0 : i32
    %c0_i32_0 = arith.constant 0 : i32
    %c0_i32_1 = arith.constant 0 : i32
    return %c0_i32, %c0_i32_0 : i32, i32
  }
  func.func @transform_4(%arg0: i32) -> (i32, i32) {
    %c0_i32 = arith.constant 0 : i32
    %c0_i32_0 = arith.constant 0 : i32
    %c0_i32_1 = arith.constant 0 : i32
    return %c0_i32, %c0_i32_0 : i32, i32
  }
  func.func @transform_5(%arg0: i32) -> (i32, i32, i32) {
    %c0_i32 = arith.constant 0 : i32
    %c0_i32_0 = arith.constant 0 : i32
    %c0_i32_1 = arith.constant 0 : i32
    return %arg0, %c0_i32, %c0_i32_0 : i32, i32, i32
  }
}

</mosaic_0001>

<bundles_post_ra>
// kernel: tpu_custom_call.1
= control target key start
LH: loop header
LB: loop body
LE: loop exit
PB: predicated region body
PF: predicated region fallthrough
CT: control target
= control target key end

     0   :  { %10 = vsyncpa [#allocation3], 0  ;;  %s1412_s0 = inlined_call_operand.hbm [shape: f32[2,64,256], index: 0, kind: input, shape index: {}]   ;;  %s1413_s1 = inlined_call_operand.vmem [shape: f32[4,64], index: 1, kind: input, shape index: {}]   ;;  %s1414_s2 = inlined_call_operand.vmem [shape: f32[4,1], index: 2, kind: input, shape index: {}]   ;;  %s1415_s3 = inlined_call_operand.vmem [shape: f32[64,4], index: 3, kind: input, shape index: {}]   ;;  %s1416_s4 = inlined_call_operand.vmem [shape: f32[64,1], index: 4, kind: input, shape index: {}]   ;;  %s1417_s5 = inlined_call_operand.hbm [shape: f32[2,64,256], index: 5, kind: output, shape index: {}]  }
   0x1   :  { %11 = vsyncpa [#allocation4], 0  ;;  %s1066_s18 = smov [#allocation2]   ;;  %s1018_s22 = scalar_lea.hbm %s1412_s0, 4096 }
   0x2   :  { %s17_s19 = sshll.u32 %s1066_s18, 4  ;;  %p1019_p0 = scmp.ne.s32.totalorder %s1412_s0, %s1018_s22  ;;  %s18_s19 = int_to_ptr.vmem [resolvable:$true] %s17_s19 }
   0x3   :  { %p1022_p1 = scmp.lt.u32.totalorder %s1018_s22, %s1412_s0 }
   0x5   :  { %p1024_p2 = pnand %p1022_p1, %p1019_p0 }
   0x7   :  { %1027 = shalt.err (!%p1024_p2)
}
   0x8   :  { %s1028_s27 = scalar_lea.vmem %s18_s19, 4096  ;;  %p1033_p4 = scmp.lt.s32.totalorder %s18_s19, %s18_s19 }
   0x9   :  { %p1029_p3 = scmp.ne.s32.totalorder %s18_s19, %s1028_s27  ;;  %p1034_p5 = scmp.lt.s32.totalorder %s1028_s27, %s1028_s27 }
   0xb   :  { %p1035_p6 = por %p1034_p5, %p1033_p4 }
   0xd   :  { %p1036_p7 = pnand %p1035_p6, %p1029_p3 }
   0xf   :  { %1039 = shalt.err (!%p1036_p7)
}
  0x10   :  { %s1067_s28 = smov 256   ;;  %s1068_s29 = smov 16  }
  0x11   :  { %23 = dma.hbm_to_vmem [thread:$0]  %s1412_s0, 4096, %s18_s19, [#allocation3], %s1067_s28, %s1067_s28, %s1068_s29  }
  0x12   :  { %1062 = dma.done.wait [#allocation3], 4096  }
  0x13   :  { %1063 = vsyncadd [#allocation3], 4294963200  ;;  %v1119_v0 = vld [vmem:[#allocation2 + $0x20] sm:$0xff]  ;;  %v1121_v1 = vld [vmem:[#allocation2 + $0x28] sm:$0xff]  ;;  %v1069_v24 = vmov 0.0|0.0   ;;  %vm1070_vm0 = vmmov 0  }
  0x14   :  { %v1123_v2 = vld [vmem:[#allocation2] sm:$0xff]  ;;  %v75_v3 = vadd.f32 %v1121_v1, %v1119_v0  ;;  %v1127_v4 = vld [vmem:[#allocation2 + $0x8] sm:$0xff]  ;;  %v1129_v5 = vld [vmem:[#allocation2 + $0x30] sm:$0xff]  ;;  %918 = vmatprep.subr.bf16.mxu0 %v1069_v24  ;;  %v1071_v25 = vmov 0.0   ;;  %vm101_vm1 = vcmask 523264   ;;  %vm176_vm2 = vcmask 31744  }
  0x15   :  { %v1131_v6 = vld [vmem:[#allocation2 + $0x38] sm:$0xff]  ;;  %v69_v7 = vadd.f32 %v1127_v4, %v1123_v2  ;;  %v1135_v8 = vld [vmem:[#allocation2 + $0x10] sm:$0xff]  ;;  %v1147_v14 = vld [vmem:[#allocation2 + $0x40] sm:$0xff]  ;;  %868 = vmatprep.mubr.msk.f32.mxu0 %vm1070_vm0, %v1071_v25  ;;  %vm201_vm3 = vcmask 1043456  }
  0x16   :  { %v1137_v9 = vld [vmem:[#allocation2 + $0x18] sm:$0xff]  ;;  %76 = vadd.xlane.f32.xlu1 %v75_v3  ;;  %v78_v10 = vadd.f32 %v1131_v6, %v1129_v5  ;;  %v1143_v12 = vld [vmem:[#allocation2 + $0x50] sm:$0xff]  ;;  %v1149_v15 = vld [vmem:[#allocation2 + $0x48] sm:$0xff] }
  0x17   :  { %70 = vadd.xlane.f32.xlu0 %v69_v7  ;;  %v72_v11 = vadd.f32 %v1137_v9, %v1135_v8  ;;  %v1145_v13 = vld [vmem:[#allocation2 + $0x58] sm:$0xff]  ;;  %v81_v17 = vadd.f32 %v1149_v15, %v1147_v14  ;;  %v1155_v18 = vld [vmem:[#allocation2 + $0x70] sm:$0xff]  ;;  %v1159_v20 = vld [vmem:[#allocation2 + $0x60] sm:$0xff] }
  0x18   :  { %v84_v16 = vadd.f32 %v1145_v13, %v1143_v12  ;;  %v1157_v19 = vld [vmem:[#allocation2 + $0x78] sm:$0xff]  ;;  %v1161_v21 = vld [vmem:[#allocation2 + $0x68] sm:$0xff]  ;;  %v1170_v26 = vld [vmem:[#allocation2 + $0x90] sm:$0xff] }
  0x19   :  { %v90_v22 = vadd.f32 %v1157_v19, %v1155_v18  ;;  %v87_v23 = vadd.f32 %v1161_v21, %v1159_v20  ;;  %v1172_v27 = vld [vmem:[#allocation2 + $0x98] sm:$0xff]  ;;  %v1174_v28 = vld [vmem:[#allocation2 + $0x80] sm:$0xff]  ;;  %v1178_v30 = vld [vmem:[#allocation2 + $0x88] sm:$0xff] }
  0x1a   :  { %79 = vadd.xlane.f32.xlu1 %v78_v10  ;;  %v450_v29 = vadd.f32 %v1172_v27, %v1170_v26  ;;  %v1180_v31 = vld [vmem:[#allocation2 + $0xb0] sm:$0xff]  ;;  %v1182_v32 = vld [vmem:[#allocation2 + $0xb8] sm:$0xff]  ;;  %v447_v33 = vadd.f32 %v1178_v30, %v1174_v28  ;;  %v1186_v34 = vld [vmem:[#allocation2 + $0xa0] sm:$0xff] }
  0x1b   :  { %73 = vadd.xlane.f32.xlu0 %v72_v11  ;;  %v1188_v35 = vld [vmem:[#allocation2 + $0xa8] sm:$0xff]  ;;  %v456_v36 = vadd.f32 %v1182_v32, %v1180_v31  ;;  %v1194_v38 = vld [vmem:[#allocation2 + $0xd0] sm:$0xff]  ;;  %v1196_v39 = vld [vmem:[#allocation2 + $0xd8] sm:$0xff] }
  0x1c   :  { %v453_v37 = vadd.f32 %v1188_v35, %v1186_v34  ;;  %v1198_v40 = vld [vmem:[#allocation2 + $0xc0] sm:$0xff]  ;;  %v1200_v41 = vld [vmem:[#allocation2 + $0xc8] sm:$0xff]  ;;  %v462_v42 = vadd.f32 %v1196_v39, %v1194_v38  ;;  %v1206_v44 = vld [vmem:[#allocation2 + $0xf0] sm:$0xff] }
  0x1d   :  { %v459_v43 = vadd.f32 %v1200_v41, %v1198_v40  ;;  %v1208_v45 = vld [vmem:[#allocation2 + $0xf8] sm:$0xff]  ;;  %v1210_v46 = vld [vmem:[#allocation2 + $0xe0] sm:$0xff]  ;;  %v1212_v47 = vld [vmem:[#allocation2 + $0xe8] sm:$0xff] }
  0x1e   :  { %85 = vadd.xlane.f32.xlu1 %v84_v16  ;;  %1419 = vst [vmem:[#allocation8_spill] sm:$0xff] %v1212_v47  ;;  %v468_v48 = vadd.f32 %v1208_v45, %v1206_v44  ;;  %v465_v49 = vadd.f32 %v1212_v47, %v1210_v46 }
  0x1f   :  { %82 = vadd.xlane.f32.xlu0 %v81_v17 }
  0x22   :  { %91 = vadd.xlane.f32.xlu1 %v90_v22  ;;  %v35_v22 = vld [vmem:[%s1413_s1] sm:$0xf] }
  0x23   :  { %88 = vadd.xlane.f32.xlu0 %v87_v23  ;;  %v37_v23 = vld [vmem:[%s1415_s3] sm:$0xff] }
  0x24   :  { %873 = vmatprep.mubr.msk.f32.mxu1 %vm176_vm2, %v37_v23 }
  0x26   :  { %451 = vadd.xlane.f32.xlu1 %v450_v29 }
  0x27   :  { %448 = vadd.xlane.f32.xlu0 %v447_v33 }
  0x2a   :  { %457 = vadd.xlane.f32.xlu1 %v456_v36 }
  0x2b   :  { %454 = vadd.xlane.f32.xlu0 %v453_v37 }
  0x2e   :  { %463 = vadd.xlane.f32.xlu1 %v462_v42  ;;  %v1233_v42 = vld [vmem:[%s1414_s2] sm:$0xf] }
  0x2f   :  { %460 = vadd.xlane.f32.xlu0 %v459_v43 }
  0x32   :  { %469 = vadd.xlane.f32.xlu1 %v468_v48 }
  0x33   :  { %466 = vadd.xlane.f32.xlu0 %v465_v49 }
  0xa3   :  { %v77_v50 = vpop.xlane.xlu1 %76 }
  0xa4   :  { %v71_v51 = vpop.xlane.xlu0 %70  ;;  %v95_v56 = vmul.f32 0.00390625, %v77_v50 }
  0xa5   :  { %v93_v54 = vmul.f32 0.00390625, %v71_v51 }
  0xa7   :  { %v80_v52 = vpop.xlane.xlu1 %79 }
  0xa8   :  { %v74_v53 = vpop.xlane.xlu0 %73  ;;  %v96_v57 = vmul.f32 0.00390625, %v80_v52 }
  0xa9   :  { %v94_v55 = vmul.f32 0.00390625, %v74_v53 }
  0xaa   :  { %v922_v63 = vpack.c.bf16 %v96_v57, %v95_v56 }
  0xab   :  { %v919_v58 = vpack.c.bf16 %v94_v55, %v93_v54  ;;  %v86_v59 = vpop.xlane.xlu1 %85 }
  0xac   :  { %v83_v60 = vpop.xlane.xlu0 %82  ;;  %v98_v61 = vmul.f32 0.00390625, %v86_v59  ;;  %v1245_v59 = vld [vmem:[%s1415_s3 + $0x10] sm:$0xff] }
  0xad   :  { %920 = vmatpush3.bf16.msra.mxu0 %v919_v58  ;;  %v97_v62 = vmul.f32 0.00390625, %v83_v60  ;;  %v1239_v58 = vld [vmem:[%s1415_s3 + $0x8] sm:$0xff] }
  0xae   :  { %921 = vmatprep.subr.bf16.mxu0 %v1069_v24 }
  0xaf   :  { %v92_v3 = vpop.xlane.xlu1 %91  ;;  %v925_v10 = vpack.c.bf16 %v98_v61, %v97_v62 }
  0xb0   :  { %v89_v7 = vpop.xlane.xlu0 %88  ;;  %v100_v11 = vmul.f32 0.00390625, %v92_v3  ;;  %v1262_v3 = vld [vmem:[%s1415_s3 + $0x20] sm:$0xff] }
  0xb1   :  { %923 = vmatpush3.bf16.msra.mxu0 %v922_v63  ;;  %v99_v16 = vmul.f32 0.00390625, %v89_v7  ;;  %v1256_v63 = vld [vmem:[%s1415_s3 + $0x18] sm:$0xff] }
  0xb2   :  { %924 = vmatprep.subr.bf16.mxu0 %v1069_v24 }
  0xb3   :  { %v928_v17 = vpack.c.bf16 %v100_v11, %v99_v16  ;;  %v452_v29 = vpop.xlane.xlu1 %451 }
  0xb4   :  { %v449_v33 = vpop.xlane.xlu0 %448  ;;  %v472_v48 = vmul.f32 0.00390625, %v452_v29  ;;  %v43_v29 = vld [vmem:[%s1415_s3 + $0x30] sm:$0xff] }
  0xb5   :  { %926 = vmatpush3.bf16.msra.mxu0 %v925_v10  ;;  %v471_v49 = vmul.f32 0.00390625, %v449_v33 }
  0xb6   :  { %927 = vmatprep.subr.bf16.mxu0 %v1069_v24 }
  0xb7   :  { %v458_v36 = vpop.xlane.xlu1 %457  ;;  %v931_v55 = vpack.c.bf16 %v472_v48, %v471_v49 }
  0xb8   :  { %v455_v37 = vpop.xlane.xlu0 %454  ;;  %v474_v56 = vmul.f32 0.00390625, %v458_v36  ;;  %v1283_v36 = vld [vmem:[%s1415_s3 + $0x38] sm:$0xff] }
  0xb9   :  { %929 = vmatpush3.bf16.msra.mxu0 %v928_v17  ;;  %v473_v57 = vmul.f32 0.00390625, %v455_v37  ;;  %v1072_v37 = vmov 0  }
  0xba   :  { %952 = vset.pattern.permute.xlu1 %v1072_v37  ;;  %953 = vset.pattern.permute.xlu0 %v1072_v37 }
  0xbb   :  { %v464_v53 = vpop.xlane.xlu1 %463  ;;  %v934_v60 = vpack.c.bf16 %v474_v56, %v473_v57 }
  0xbc   :  { %869 = vmatmul.mubr.msk.f32.vlgmr.msra.gmra.mrb[0].mxu0 %vm101_vm1, %v35_v22  ;;  %v461_v54 = vpop.xlane.xlu0 %460  ;;  %v476_v61 = vmul.f32 0.00390625, %v464_v53 }
  0xbd   :  { %906 = vmatprep.mubr.msk.f32.mxu0 %vm176_vm2, %v37_v23  ;;  %v475_v62 = vmul.f32 0.00390625, %v461_v54  ;;  %v1271_v23 = vld [vmem:[%s1415_s3 + $0x28] sm:$0xff] }
  0xbf   :  { %v470_v7 = vpop.xlane.xlu1 %469  ;;  %v937_v11 = vpack.c.bf16 %v476_v61, %v475_v62  ;;  %v1319_v62 = vld [vmem:[%s1416_s4 + $0x28] sm:$0xff] }
  0xc0   :  { %v467_v10 = vpop.xlane.xlu0 %466  ;;  %v478_v16 = vmul.f32 0.00390625, %v470_v7 }
  0xc1   :  { %v477_v17 = vmul.f32 0.00390625, %v467_v10  ;;  %v1324_v10 = vld [vmem:[%s1416_s4 + $0x20] sm:$0xff] }
  0xc3   :  { %v940_v33 = vpack.c.bf16 %v478_v16, %v477_v17 }
 0x18f   :  { %v171_v43 = vpop.f32.mrb[0].mxu0 }
 0x190   :  { %v172_v50 = vadd.f32 %v171_v43, %v1233_v42  ;;  %v870_v51 = vpop.f32.mrb[1].mxu0  ;;  %v1295_v43 = vld [vmem:[%s1416_s4 + $0x8] sm:$0xff] }
 0x192   :  { %v175_v52 = vmax.f32 %v172_v50, 0.0  ;;  %v1307_v50 = vld [vmem:[%s1416_s4 + $0x18] sm:$0xff] }
 0x194   :  { %871 = vmatprep.subr.msk.mxu1 %vm201_vm3, %v175_v52 }
 0x195   :  { %872 = vmatpush3.msk.msra.mxu1 %vm201_vm3, %v175_v52  ;;  %v1312_v52 = vld [vmem:[%s1416_s4 + $0x10] sm:$0xff] }
 0x196   :  { %874 = vmatmul.mubr.msk.f32.vlgmr.msra.gmra.mrb[0].mxu1 %vm176_vm2, %v1239_v58  ;;  %930 = vmatprep.subr.bf16.mxu1 %v1069_v24 }
 0x197   :  { %932 = vmatpush3.bf16.msra.mxu1 %v931_v55  ;;  %876 = vmatprep.mubr.msk.f32.mxu1 %vm176_vm2, %v1245_v59 }
 0x198   :  { %933 = vmatprep.subr.bf16.mxu1 %v1069_v24 }
 0x19a   :  { %877 = vmatmul.mubr.msk.f32.gmra.mrb[2].mxu1 %vm176_vm2, %v1256_v63 }
 0x19b   :  { %935 = vmatpush3.bf16.msra.mxu1 %v934_v60  ;;  %879 = vmatprep.mubr.msk.f32.mxu1 %vm176_vm2, %v1262_v3 }
 0x19c   :  { %936 = vmatprep.subr.bf16.mxu1 %v1069_v24 }
 0x19e   :  { %880 = vmatmul.mubr.msk.f32.gmra.mrb[4].mxu1 %vm176_vm2, %v1271_v23 }
 0x19f   :  { %938 = vmatpush3.bf16.msra.mxu1 %v937_v11  ;;  %882 = vmatprep.mubr.msk.f32.mxu1 %vm176_vm2, %v43_v29 }
 0x1a0   :  { %939 = vmatprep.subr.bf16.mxu1 %v1069_v24  ;;  %v1300_v24 = vld [vmem:[%s1416_s4] sm:$0xff] }
 0x1a2   :  { %883 = vmatmul.mubr.msk.f32.gmra.mrb[6].mxu1 %vm176_vm2, %v1283_v36 }
 0x1a3   :  { %941 = vmatpush3.bf16.msra.mxu1 %v940_v33  ;;  %901 = vmatprep.mubr.msk.f32.mxu1 %vm1070_vm0, %v1071_v25 }
 0x1a6   :  { %902 = vmatmul.mubr.msk.f32.vlgmr.msra.gmra.mrb[8].mxu1 %vm101_vm1, %v35_v22 }
 0x1a7   :  { %915 = vmatprep.mubr.msk.f32.mxu1 %vm176_vm2, %v43_v29 }
 0x269   :  { %v875_v48 = vpop.f32.mrb[0].mxu1 }
 0x26a   :  { %v277_v25 = vadd.f32 %v875_v48, %v1295_v43  ;;  %v271_v49 = vpop.f32.mrb[1].mxu1 }
 0x26b   :  { %v272_v22 = vadd.f32 %v271_v49, %v1300_v24 }
 0x26c   :  { %v311_v51 = vsub.f32 0.0, %v277_v25  ;;  %v1331_v25 = vld [vmem:[%s1416_s4 + $0x38] sm:$0xff] }
 0x26d   :  { %v310_v53 = vsub.f32 0.0, %v272_v22  ;;  %v878_v54 = vpop.f32.mrb[2].mxu1 }
 0x26e   :  { %v320_v55 = vmul.f32 1.442695, %v311_v51  ;;  %v287_v56 = vadd.f32 %v878_v54, %v1307_v50  ;;  %v281_v57 = vpop.f32.mrb[3].mxu1 }
 0x26f   :  { %v318_v60 = vmul.f32 1.442695, %v310_v53  ;;  %v282_v61 = vadd.f32 %v281_v57, %v1312_v52  ;;  %v1336_v53 = vld [vmem:[%s1416_s4 + $0x30] sm:$0xff]  ;;  %s1073_s4 = smov [#allocation5]  }
 0x270   :  { %954 = vpow2.f32 %v320_v55  ;;  %v313_v7 = vsub.f32 0.0, %v287_v56  ;;  %s784_s13 = sshll.u32 %s1073_s4, 4  ;;  %s785_s13 = int_to_ptr.vmem [resolvable:$true] %s784_s13 }
 0x271   :  { %956 = vpow2.f32 %v318_v60  ;;  %v312_v11 = vsub.f32 0.0, %v282_v61  ;;  %v881_v16 = vpop.f32.mrb[4].mxu1  ;;  %s1040_s14 = scalar_lea.vmem %s785_s13, 4096  ;;  %p1045_p9 = scmp.lt.s32.totalorder %s785_s13, %s785_s13 }
 0x272   :  { %v324_v17 = vmul.f32 1.442695, %v313_v7  ;;  %v297_v29 = vadd.f32 %v881_v16, %v1319_v62  ;;  %v291_v33 = vpop.f32.mrb[5].mxu1  ;;  %p1041_p8 = scmp.ne.s32.totalorder %s785_s13, %s1040_s14  ;;  %p1046_p10 = scmp.lt.s32.totalorder %s1040_s14, %s1040_s14 }
 0x273   :  { %v322_v37 = vmul.f32 1.442695, %v312_v11  ;;  %v292_v48 = vadd.f32 %v291_v33, %v1324_v10 }
 0x274   :  { %958 = vpow2.f32 %v324_v17  ;;  %v315_v49 = vsub.f32 0.0, %v297_v29  ;;  %p1047_p11 = por %p1046_p10, %p1045_p9 }
 0x275   :  { %960 = vpow2.f32 %v322_v37  ;;  %v314_v22 = vsub.f32 0.0, %v292_v48  ;;  %v884_v51 = vpop.f32.mrb[6].mxu1 }
 0x276   :  { %v328_v54 = vmul.f32 1.442695, %v315_v49  ;;  %v307_v55 = vadd.f32 %v884_v51, %v1331_v25  ;;  %v301_v56 = vpop.f32.mrb[7].mxu1  ;;  %p1048_p12 = pnand %p1047_p11, %p1041_p8 }
 0x277   :  { %v326_v57 = vmul.f32 1.442695, %v314_v22  ;;  %v302_v61 = vadd.f32 %v301_v56, %v1336_v53 }
 0x278   :  { %962 = vpow2.f32 %v328_v54  ;;  %v317_v60 = vsub.f32 0.0, %v307_v55 }
 0x279   :  { %v545_v7 = vpop.f32.mrb[8].mxu1  ;;  %964 = vpow2.f32 %v326_v57  ;;  %v316_v47 = vsub.f32 0.0, %v302_v61 }
 0x27a   :  { %v955_v11 = vpop.eup %954  ;;  %v546_v16 = vadd.f32 %v545_v7, %v1233_v42  ;;  %v903_v17 = vpop.f32.mrb[9].mxu1  ;;  %v332_v48 = vmul.f32 1.442695, %v317_v60 }
 0x27b   :  { %v957_v29 = vpop.eup %956  ;;  %v335_v33 = vadd.f32 1.0, %v955_v11  ;;  %v330_v42 = vmul.f32 1.442695, %v316_v47 }
 0x27c   :  { %v334_v37 = vadd.f32 1.0, %v957_v29  ;;  %v549_v49 = vmax.f32 %v546_v16, 0.0 }
 0x27d   :  { %966 = vrcp.f32 %v335_v33 }
 0x27e   :  { %v959_v51 = vpop.eup %958  ;;  %968 = vrcp.f32 %v334_v37  ;;  %904 = vmatprep.subr.msk.mxu0 %vm201_vm3, %v549_v49  ;;  %942 = vmatprep.subr.msk.mxu1 %vm201_vm3, %v549_v49 }
 0x27f   :  { %v961_v22 = vpop.eup %960  ;;  %v337_v54 = vadd.f32 1.0, %v959_v51  ;;  %905 = vmatpush3.msk.msra.mxu0 %vm201_vm3, %v549_v49  ;;  %943 = vmatpush3.msk.msra.mxu1 %vm201_vm3, %v549_v49  ;;  %970 = vpow2.f32 %v332_v48 }
 0x280   :  { %907 = vmatmul.mubr.msk.f32.vlgmr.msra.gmra.mrb[2].mxu0 %vm176_vm2, %v1239_v58  ;;  %916 = vmatmul.mubr.msk.f32.vlgmr.msra.gmra.mrb[10].mxu1 %vm176_vm2, %v1283_v36  ;;  %v336_v55 = vadd.f32 1.0, %v961_v22 }
 0x281   :  { %972 = vrcp.f32 %v337_v54  ;;  %909 = vmatprep.mubr.msk.f32.mxu0 %vm176_vm2, %v1245_v59 }
 0x282   :  { %v963_v56 = vpop.eup %962  ;;  %974 = vpow2.f32 %v330_v42 }
 0x283   :  { %v965_v57 = vpop.eup %964  ;;  %976 = vrcp.f32 %v336_v55  ;;  %v339_v60 = vadd.f32 1.0, %v963_v56 }
 0x284   :  { %910 = vmatmul.mubr.msk.f32.gmra.mrb[4].mxu0 %vm176_vm2, %v1256_v63  ;;  %v338_v36 = vadd.f32 1.0, %v965_v57 }
 0x285   :  { %912 = vmatprep.mubr.msk.f32.mxu0 %vm176_vm2, %v1262_v3  ;;  %978 = vrcp.f32 %v339_v60 }
 0x286   :  { %980 = vrcp.f32 %v338_v36 }
 0x287   :  { %v967_v47 = vpop.eup %966 }
 0x288   :  { %v969_v58 = vpop.eup %968  ;;  %365 = vperm.xlu1 %952, %v967_v47   ;;  %913 = vmatmul.mubr.msk.f32.gmra.mrb[6].mxu0 %vm176_vm2, %v1271_v23 }
 0x289   :  { %360 = vperm.xlu0 %953, %v969_v58   ;;  %v971_v59 = vpop.eup %970 }
 0x28a   :  { %v341_v63 = vadd.f32 1.0, %v971_v59 }
 0x28b   :  { %v973_v61 = vpop.eup %972 }
 0x28c   :  { %375 = vperm.xlu1 %952, %v973_v61   ;;  %v975_v7 = vpop.eup %974  ;;  %982 = vrcp.f32 %v341_v63 }
 0x28d   :  { %v977_v11 = vpop.eup %976  ;;  %v340_v16 = vadd.f32 1.0, %v975_v7 }
 0x28f   :  { %v979_v3 = vpop.eup %978  ;;  %984 = vrcp.f32 %v340_v16 }
 0x290   :  { %370 = vperm.xlu1 %952, %v977_v11   ;;  %v981_v17 = vpop.eup %980 }
 0x294   :  { %385 = vperm.xlu1 %952, %v979_v3  }
 0x296   :  { %v983_v29 = vpop.eup %982 }
 0x298   :  { %380 = vperm.xlu1 %952, %v981_v17  }
 0x299   :  { %v985_v23 = vpop.eup %984 }
 0x29c   :  { %395 = vperm.xlu1 %952, %v983_v29  }
 0x2a0   :  { %390 = vperm.xlu1 %952, %v985_v23  }
 0x307   :  { %v366_v33 = vpop.permute.xlu1 %365 }
 0x308   :  { %v400_v37 = vmul.f32 %v366_v33, %v1135_v8  ;;  %v401_v48 = vmul.f32 %v366_v33, %v1137_v9  ;;  %v361_v49 = vpop.permute.xlu0 %360 }
 0x309   :  { %v398_v51 = vmul.f32 %v361_v49, %v1123_v2  ;;  %v399_v22 = vmul.f32 %v361_v49, %v1127_v4 }
 0x30a   :  { %416 = vst [vmem:[#allocation5 + $0x10] sm:$0xff] %v400_v37  ;;  %417 = vst [vmem:[#allocation5 + $0x18] sm:$0xff] %v401_v48 }
 0x30b   :  { %414 = vst [vmem:[#allocation5] sm:$0xff] %v398_v51  ;;  %415 = vst [vmem:[#allocation5 + $0x8] sm:$0xff] %v399_v22  ;;  %v376_v54 = vpop.permute.xlu1 %375 }
 0x30c   :  { %v404_v42 = vmul.f32 %v376_v54, %v1129_v5  ;;  %v405_v55 = vmul.f32 %v376_v54, %v1131_v6 }
 0x30e   :  { %420 = vst [vmem:[#allocation5 + $0x30] sm:$0xff] %v404_v42  ;;  %421 = vst [vmem:[#allocation5 + $0x38] sm:$0xff] %v405_v55 }
 0x30f   :  { %v371_v56 = vpop.permute.xlu1 %370 }
 0x310   :  { %v402_v8 = vmul.f32 %v371_v56, %v1119_v0  ;;  %v403_v9 = vmul.f32 %v371_v56, %v1121_v1 }
 0x312   :  { %418 = vst [vmem:[#allocation5 + $0x20] sm:$0xff] %v402_v8  ;;  %419 = vst [vmem:[#allocation5 + $0x28] sm:$0xff] %v403_v9 }
 0x313   :  { %v386_v2 = vpop.permute.xlu1 %385 }
 0x314   :  { %v408_v4 = vmul.f32 %v386_v2, %v1143_v12  ;;  %v409_v57 = vmul.f32 %v386_v2, %v1145_v13 }
 0x316   :  { %424 = vst [vmem:[#allocation5 + $0x50] sm:$0xff] %v408_v4  ;;  %425 = vst [vmem:[#allocation5 + $0x58] sm:$0xff] %v409_v57 }
 0x317   :  { %v381_v60 = vpop.permute.xlu1 %380 }
 0x318   :  { %v406_v5 = vmul.f32 %v381_v60, %v1147_v14  ;;  %v407_v6 = vmul.f32 %v381_v60, %v1149_v15 }
 0x31a   :  { %422 = vst [vmem:[#allocation5 + $0x40] sm:$0xff] %v406_v5  ;;  %423 = vst [vmem:[#allocation5 + $0x48] sm:$0xff] %v407_v6 }
 0x31b   :  { %v396_v47 = vpop.permute.xlu1 %395 }
 0x31c   :  { %v412_v0 = vmul.f32 %v396_v47, %v1155_v18  ;;  %v413_v1 = vmul.f32 %v396_v47, %v1157_v19 }
 0x31e   :  { %428 = vst [vmem:[#allocation5 + $0x70] sm:$0xff] %v412_v0  ;;  %429 = vst [vmem:[#allocation5 + $0x78] sm:$0xff] %v413_v1 }
 0x31f   :  { %v391_v58 = vpop.permute.xlu1 %390 }
 0x320   :  { %v410_v12 = vmul.f32 %v391_v58, %v1159_v20  ;;  %v411_v13 = vmul.f32 %v391_v58, %v1161_v21 }
 0x322   :  { %426 = vst [vmem:[#allocation5 + $0x60] sm:$0xff] %v410_v12  ;;  %427 = vst [vmem:[#allocation5 + $0x68] sm:$0xff] %v411_v13 }
 0x353   :  { %v908_v36 = vpop.f32.mrb[2].mxu0  ;;  %v917_v14 = vpop.f32.mrb[10].mxu1 }
 0x354   :  { %v625_v15 = vadd.f32 %v908_v36, %v1295_v43  ;;  %v619_v59 = vpop.f32.mrb[3].mxu0  ;;  %v655_v61 = vadd.f32 %v917_v14, %v1331_v25  ;;  %v649_v63 = vpop.f32.mrb[11].mxu1 }
 0x355   :  { %v620_v18 = vadd.f32 %v619_v59, %v1300_v24  ;;  %v650_v19 = vadd.f32 %v649_v63, %v1336_v53 }
 0x356   :  { %v659_v7 = vsub.f32 0.0, %v625_v15  ;;  %v665_v17 = vsub.f32 0.0, %v655_v61 }
 0x357   :  { %v658_v11 = vsub.f32 0.0, %v620_v18  ;;  %v911_v16 = vpop.f32.mrb[4].mxu0  ;;  %v664_v43 = vsub.f32 0.0, %v650_v19 }
 0x358   :  { %v668_v20 = vmul.f32 1.442695, %v659_v7  ;;  %v635_v21 = vadd.f32 %v911_v16, %v1307_v50  ;;  %v629_v3 = vpop.f32.mrb[5].mxu0  ;;  %v680_v49 = vmul.f32 1.442695, %v665_v17 }
 0x359   :  { %v666_v29 = vmul.f32 1.442695, %v658_v11  ;;  %v630_v23 = vadd.f32 %v629_v3, %v1312_v52  ;;  %v678_v50 = vmul.f32 1.442695, %v664_v43 }
 0x35a   :  { %986 = vpow2.f32 %v668_v20  ;;  %v661_v33 = vsub.f32 0.0, %v635_v21 }
 0x35b   :  { %988 = vpow2.f32 %v666_v29  ;;  %v660_v25 = vsub.f32 0.0, %v630_v23  ;;  %v914_v37 = vpop.f32.mrb[6].mxu0 }
 0x35c   :  { %v672_v24 = vmul.f32 1.442695, %v661_v33  ;;  %v645_v53 = vadd.f32 %v914_v37, %v1319_v62  ;;  %v639_v48 = vpop.f32.mrb[7].mxu0 }
 0x35d   :  { %v670_v51 = vmul.f32 1.442695, %v660_v25  ;;  %v640_v22 = vadd.f32 %v639_v48, %v1324_v10 }
 0x35e   :  { %990 = vpow2.f32 %v672_v24  ;;  %v663_v54 = vsub.f32 0.0, %v645_v53 }
 0x35f   :  { %992 = vpow2.f32 %v670_v51  ;;  %v662_v42 = vsub.f32 0.0, %v640_v22 }
 0x360   :  { %v676_v52 = vmul.f32 1.442695, %v663_v54  ;;  %994 = vpow2.f32 %v680_v49 }
 0x361   :  { %v674_v55 = vmul.f32 1.442695, %v662_v42  ;;  %996 = vpow2.f32 %v678_v50 }
 0x362   :  { %998 = vpow2.f32 %v676_v52 }
 0x363   :  { %1000 = vpow2.f32 %v674_v55 }
 0x364   :  { %v987_v56 = vpop.eup %986 }
 0x365   :  { %v989_v8 = vpop.eup %988  ;;  %v683_v9 = vadd.f32 1.0, %v987_v56 }
 0x366   :  { %v682_v62 = vadd.f32 1.0, %v989_v8 }
 0x367   :  { %1002 = vrcp.f32 %v683_v9 }
 0x368   :  { %v991_v2 = vpop.eup %990  ;;  %1004 = vrcp.f32 %v682_v62 }
 0x369   :  { %v993_v4 = vpop.eup %992  ;;  %v685_v10 = vadd.f32 1.0, %v991_v2 }
 0x36a   :  { %v995_v57 = vpop.eup %994  ;;  %v684_v60 = vadd.f32 1.0, %v993_v4 }
 0x36b   :  { %v997_v5 = vpop.eup %996  ;;  %1006 = vrcp.f32 %v685_v10  ;;  %v689_v1 = vadd.f32 1.0, %v995_v57 }
 0x36c   :  { %v999_v6 = vpop.eup %998  ;;  %1008 = vrcp.f32 %v684_v60  ;;  %v688_v12 = vadd.f32 1.0, %v997_v5 }
 0x36d   :  { %v1001_v47 = vpop.eup %1000  ;;  %v687_v0 = vadd.f32 1.0, %v999_v6 }
 0x36e   :  { %v686_v58 = vadd.f32 1.0, %v1001_v47 }
 0x36f   :  { %1010 = vrcp.f32 %v687_v0 }
 0x370   :  { %1012 = vrcp.f32 %v686_v58 }
 0x371   :  { %v1003_v13 = vpop.eup %1002  ;;  %1014 = vrcp.f32 %v689_v1 }
 0x372   :  { %v1005_v36 = vpop.eup %1004  ;;  %1016 = vrcp.f32 %v688_v12  ;;  %713 = vperm.xlu0 %953, %v1003_v13  }
 0x373   :  { %708 = vperm.xlu1 %952, %v1005_v36  }
 0x375   :  { %v1007_v14 = vpop.eup %1006 }
 0x376   :  { %v1009_v15 = vpop.eup %1008  ;;  %723 = vperm.xlu0 %953, %v1007_v14  }
 0x377   :  { %718 = vperm.xlu1 %952, %v1009_v15  }
 0x379   :  { %v1011_v59 = vpop.eup %1010 }
 0x37a   :  { %v1013_v61 = vpop.eup %1012  ;;  %733 = vperm.xlu0 %953, %v1011_v59  }
 0x37b   :  { %v1015_v63 = vpop.eup %1014  ;;  %728 = vperm.xlu1 %952, %v1013_v61  }
 0x37c   :  { %v1017_v18 = vpop.eup %1016 }
 0x37e   :  { %743 = vperm.xlu0 %953, %v1015_v63  }
 0x37f   :  { %738 = vperm.xlu1 %952, %v1017_v18  }
 0x3f1   :  { %v714_v19 = vpop.permute.xlu0 %713 }
 0x3f2   :  { %v748_v7 = vmul.f32 %v714_v19, %v1170_v26  ;;  %v749_v11 = vmul.f32 %v714_v19, %v1172_v27  ;;  %v709_v16 = vpop.permute.xlu1 %708 }
 0x3f3   :  { %v746_v20 = vmul.f32 %v709_v16, %v1174_v28  ;;  %v747_v21 = vmul.f32 %v709_v16, %v1178_v30 }
 0x3f4   :  { %765 = vst [vmem:[#allocation5 + $0x90] sm:$0xff] %v748_v7  ;;  %766 = vst [vmem:[#allocation5 + $0x98] sm:$0xff] %v749_v11 }
 0x3f5   :  { %763 = vst [vmem:[#allocation5 + $0x80] sm:$0xff] %v746_v20  ;;  %764 = vst [vmem:[#allocation5 + $0x88] sm:$0xff] %v747_v21  ;;  %v724_v3 = vpop.permute.xlu0 %723 }
 0x3f6   :  { %v752_v17 = vmul.f32 %v724_v3, %v1180_v31  ;;  %v753_v29 = vmul.f32 %v724_v3, %v1182_v32  ;;  %v719_v23 = vpop.permute.xlu1 %718 }
 0x3f7   :  { %v750_v43 = vmul.f32 %v719_v23, %v1186_v34  ;;  %v751_v26 = vmul.f32 %v719_v23, %v1188_v35 }
 0x3f8   :  { %769 = vst [vmem:[#allocation5 + $0xb0] sm:$0xff] %v752_v17  ;;  %770 = vst [vmem:[#allocation5 + $0xb8] sm:$0xff] %v753_v29 }
 0x3f9   :  { %767 = vst [vmem:[#allocation5 + $0xa0] sm:$0xff] %v750_v43  ;;  %768 = vst [vmem:[#allocation5 + $0xa8] sm:$0xff] %v751_v26  ;;  %v734_v27 = vpop.permute.xlu0 %733 }
 0x3fa   :  { %v756_v28 = vmul.f32 %v734_v27, %v1194_v38  ;;  %v757_v30 = vmul.f32 %v734_v27, %v1196_v39  ;;  %v729_v33 = vpop.permute.xlu1 %728  ;;  %v1420_v39 = vld [vmem:[#allocation8_spill] sm:$0xff] }
 0x3fb   :  { %v754_v25 = vmul.f32 %v729_v33, %v1198_v40  ;;  %v755_v31 = vmul.f32 %v729_v33, %v1200_v41 }
 0x3fc   :  { %773 = vst [vmem:[#allocation5 + $0xd0] sm:$0xff] %v756_v28  ;;  %774 = vst [vmem:[#allocation5 + $0xd8] sm:$0xff] %v757_v30 }
 0x3fd   :  { %771 = vst [vmem:[#allocation5 + $0xc0] sm:$0xff] %v754_v25  ;;  %772 = vst [vmem:[#allocation5 + $0xc8] sm:$0xff] %v755_v31  ;;  %v744_v32 = vpop.permute.xlu0 %743 }
 0x3fe   :  { %v760_v34 = vmul.f32 %v744_v32, %v1206_v44  ;;  %v761_v35 = vmul.f32 %v744_v32, %v1208_v45  ;;  %v739_v37 = vpop.permute.xlu1 %738 }
 0x3ff   :  { %v758_v38 = vmul.f32 %v739_v37, %v1210_v46  ;;  %v759_v24 = vmul.f32 %v739_v37, %v1420_v39 }
 0x400   :  { %777 = vst [vmem:[#allocation5 + $0xf0] sm:$0xff] %v760_v34  ;;  %778 = vst [vmem:[#allocation5 + $0xf8] sm:$0xff] %v761_v35 }
 0x401   :  { %775 = vst [vmem:[#allocation5 + $0xe0] sm:$0xff] %v758_v38  ;;  %776 = vst [vmem:[#allocation5 + $0xe8] sm:$0xff] %v759_v24 }
 0x402   :  { %1051 = shalt.err (!%p1048_p12)
}
 0x403   :  { %s1052_s17 = scalar_lea.hbm %s1417_s5, 4096 }
 0x404   :  { %p1053_p13 = scmp.ne.s32.totalorder %s1417_s5, %s1052_s17  ;;  %p1056_p0 = scmp.lt.u32.totalorder %s1052_s17, %s1417_s5 }
 0x406   :  { %p1058_p1 = pnand %p1056_p0, %p1053_p13 }
 0x408   :  { %1061 = shalt.err (!%p1058_p1)
}
 0x409   :  { %790 = dma.vmem_to_hbm [thread:$0]  %s785_s13, 4096, %s1417_s5, [#allocation4], %s1067_s28, %s1067_s28, %s1068_s29  }
 0x40a   :  { %1064 = dma.done.wait [#allocation4], 4096  }
 0x40b   :  { %1065 = vsyncadd [#allocation4], 4294963200 }
 0x40c   :  { %794 = vsyncpa [#allocation3], 1 }
 0x40d   :  { %795 = vsyncpa [#allocation4], 1 }

</bundles_post_ra>
